<compile_context>
chip_gen: v7x
topology: tpu7x:2x2x1
jax: 0.10.0
libtpu: 0.0.40
codegen_flags: <defaults>
</compile_context>

<pallas_src>
import jax
import jax.numpy as jnp
from jax import lax
from jax.experimental import pallas as pl
from jax.experimental.pallas import tpu as pltpu


HIDDEN = 40   # fixed by the PyTorch module
SUB_B = 128   # in-kernel sub-chunk rows (multiple of 8 sublanes)


def _round_up(x: int, m: int) -> int:
    return ((x + m - 1) // m) * m


def _make_slp_kernel(sub_b: int, n_sub: int):
    """Kernel over one (tile_b, D_in) x-block, processed in `n_sub` sub-chunks."""

    def kernel(x_ref, w1_ref, b1_ref, w2_ref, b2_ref, o_ref):
        # Tiny weights/biases: load once per grid step (VMEM-resident blocks).
        w1 = w1_ref[...]
        b1 = b1_ref[...]          # (1, H)  -> broadcasts over batch rows
        w2 = w2_ref[...]
        b2 = b2_ref[...]          # (1, D_out)

        def mlp(x):
            h = jnp.dot(x, w1, preferred_element_type=jnp.float32,
                        precision=lax.Precision.HIGHEST)
            h = jnp.maximum(h + b1, 0.0)
            y = jnp.dot(h, w2, preferred_element_type=jnp.float32,
                        precision=lax.Precision.HIGHEST)
            return (y + b2).astype(o_ref.dtype)

        if n_sub == 1:
            o_ref[...] = mlp(x_ref[...])
        else:
            def body(c, carry):
                r = pl.multiple_of(c * sub_b, sub_b)
                o_ref[pl.ds(r, sub_b), :] = mlp(x_ref[pl.ds(r, sub_b), :])
                return carry
            # Fully unrolled so the LLO scheduler sees the whole block's work.
            lax.fori_loop(0, n_sub, body, 0, unroll=True)

    return kernel


def _choose_tile(B: int, tile_b: int):
    """Pick (block rows, sub-chunk rows); block rows is a multiple of sub rows."""
    if B <= SUB_B:
        tb = max(8, _round_up(B, 8))     # one tiny block, one sub-chunk
        return tb, tb
    half = -(-B // 2)                     # cdiv(B, 2): keep >=2 grid steps (v7x 2 TCs)
    tb = min(tile_b, _round_up(half, SUB_B), _round_up(B, SUB_B))
    tb = max(SUB_B, _round_up(tb, SUB_B))
    return tb, SUB_B


def slp_forward(x, w1, b1, w2, b2, *, tile_b: int = 2048):
    """x: (B, D_in) f32 -> (B, D_out) f32, matching SLP.forward semantics."""
    B, D_in = x.shape
    H = w1.shape[1]
    D_out = w2.shape[1]

    tb, sub_b = _choose_tile(B, tile_b)
    n_sub = tb // sub_b
    nb = pl.cdiv(B, tb)                   # ragged tail handled by Pallas masking

    b1_2d = b1.reshape(1, H)
    b2_2d = b2.reshape(1, D_out)

    # Advisory cost hint so XLA schedules sensibly around the custom call.
    flops = 2 * B * (D_in * H + H * D_out)
    bytes_accessed = 4 * (B * D_in + D_in * H + H + H * D_out + D_out + B * D_out)
    cost = pl.CostEstimate(flops=flops, transcendentals=0,
                           bytes_accessed=bytes_accessed)

    return pl.pallas_call(
        _make_slp_kernel(sub_b, n_sub),
        out_shape=jax.ShapeDtypeStruct((B, D_out), jnp.float32),
        grid=(nb,),
        in_specs=[
            pl.BlockSpec((tb, D_in), lambda i: (i, 0)),     # x tile (pipelined)
            pl.BlockSpec((D_in, H), lambda i: (0, 0)),      # w1 (resident)
            pl.BlockSpec((1, H), lambda i: (0, 0)),         # b1 (resident)
            pl.BlockSpec((H, D_out), lambda i: (0, 0)),     # w2 (resident)
            pl.BlockSpec((1, D_out), lambda i: (0, 0)),     # b2 (resident)
        ],
        out_specs=pl.BlockSpec((tb, D_out), lambda i: (i, 0)),
        compiler_params=pltpu.CompilerParams(
            dimension_semantics=("parallel",),
        ),
        cost_estimate=cost,
    )(x, w1, b1_2d, w2, b2_2d)


def init_slp_params(key, input_shape, output_shape, hidden_shape=HIDDEN):
    """Deterministic init mimicking torch.nn.Linear default (uniform +-1/sqrt(fan_in))."""
    k1, k2, k3, k4 = jax.random.split(key, 4)
    bound1 = 1.0 / jnp.sqrt(jnp.float32(input_shape))
    bound2 = 1.0 / jnp.sqrt(jnp.float32(hidden_shape))
    w1 = jax.random.uniform(k1, (input_shape, hidden_shape), jnp.float32, -bound1, bound1)
    b1 = jax.random.uniform(k2, (hidden_shape,), jnp.float32, -bound1, bound1)
    w2 = jax.random.uniform(k3, (hidden_shape, output_shape), jnp.float32, -bound2, bound2)
    b2 = jax.random.uniform(k4, (output_shape,), jnp.float32, -bound2, bound2)
    return w1, b1, w2, b2


if __name__ == "__main__":
    key = jax.random.PRNGKey(0)
    pkey, xkey1, xkey2 = jax.random.split(key, 3)

    input_shape = 32   # SLP(input_shape=(32,), ...)
    output_shape = 4   # SLP(..., output_shape=4, ...)
    w1, b1, w2, b2 = init_slp_params(pkey, input_shape, output_shape)

    def ref(xx):
        return jnp.maximum(xx @ w1 + b1, 0.0) @ w2 + b2

    # Small batch (typical RL usage) — single block, single sub-chunk.
    x_small = jax.random.normal(xkey1, (8, input_shape), jnp.float32)
    y_small = jax.block_until_ready(slp_forward(x_small, w1, b1, w2, b2))
    assert y_small.shape == (8, output_shape)
    assert jnp.allclose(y_small, ref(x_small), atol=1e-4, rtol=1e-4)

    # Larger, non-multiple-of-tile batch — exercises 2-step grid, sub-chunk
    # loop, and Pallas' masked ragged-tail handling (no wrapper pad/copy).
    x_big = jax.random.normal(xkey2, (600, input_shape), jnp.float32)
    y_big = jax.block_until_ready(slp_forward(x_big, w1, b1, w2, b2))
    assert y_big.shape == (600, output_shape)
    assert jnp.allclose(y_big, ref(x_big), atol=1e-4, rtol=1e-4)

    # TODO(synk): the Adam optimizer / training step in the PyTorch module is
    # not part of the forward pass and is intentionally not implemented here.
    print("KERNEL_OK")
</pallas_src>

<mosaic_0001>
module attributes {stable_mosaic.version = 11 : i64} {
  func.func @kernel(%arg0: i32, %arg1: memref<8x32xf32, #tpu.memory_space<vmem>>, %arg2: memref<32x40xf32, #tpu.memory_space<vmem>>, %arg3: memref<1x40xf32, #tpu.memory_space<vmem>>, %arg4: memref<40x4xf32, #tpu.memory_space<vmem>>, %arg5: memref<1x4xf32, #tpu.memory_space<vmem>>, %arg6: memref<8x4xf32, #tpu.memory_space<vmem>>) attributes {dimension_semantics = [#tpu.dimension_semantics<parallel>], iteration_bounds = array<i64: 1>, scalar_prefetch = 0 : i64, scratch_operands = 0 : i64, tpu.core_type = #tpu.core_type<tc>, window_params = [{transform_indices = @transform_0, window_bounds = array<i64: 8, 32>}, {pipeline_mode = #tpu.pipeline_mode<synchronous>, transform_indices = @transform_1, window_bounds = array<i64: 32, 40>}, {pipeline_mode = #tpu.pipeline_mode<synchronous>, transform_indices = @transform_2, window_bounds = array<i64: 1, 40>}, {pipeline_mode = #tpu.pipeline_mode<synchronous>, transform_indices = @transform_3, window_bounds = array<i64: 40, 4>}, {pipeline_mode = #tpu.pipeline_mode<synchronous>, transform_indices = @transform_4, window_bounds = array<i64: 1, 4>}, {transform_indices = @transform_5, window_bounds = array<i64: 8, 4>}]} {
    %c0 = arith.constant 0 : index
    %c0_0 = arith.constant 0 : index
    %0 = vector.load %arg2[%c0, %c0_0] : memref<32x40xf32, #tpu.memory_space<vmem>>, vector<32x40xf32>
    %c0_1 = arith.constant 0 : index
    %c0_2 = arith.constant 0 : index
    %1 = vector.load %arg3[%c0_1, %c0_2] : memref<1x40xf32, #tpu.memory_space<vmem>>, vector<1x40xf32>
    %c0_3 = arith.constant 0 : index
    %c0_4 = arith.constant 0 : index
    %2 = vector.load %arg4[%c0_3, %c0_4] : memref<40x4xf32, #tpu.memory_space<vmem>>, vector<40x4xf32>
    %c0_5 = arith.constant 0 : index
    %c0_6 = arith.constant 0 : index
    %3 = vector.load %arg5[%c0_5, %c0_6] : memref<1x4xf32, #tpu.memory_space<vmem>>, vector<1x4xf32>
    %c0_7 = arith.constant 0 : index
    %c0_8 = arith.constant 0 : index
    %4 = vector.load %arg1[%c0_7, %c0_8] : memref<8x32xf32, #tpu.memory_space<vmem>>, vector<8x32xf32>
    %cst = arith.constant dense<0.000000e+00> : vector<8x40xf32>
    %5 = tpu.matmul %4, %0, %cst {dimension_numbers = #tpu.dot_dimension_numbers<[1], [0], [0], [1], [0, 0, 1, 1], [], []>, precision = #tpu.contract_precision<fp32>} : vector<8x32xf32>, vector<32x40xf32>, vector<8x40xf32> -> vector<8x40xf32>
    %6 = vector.broadcast %1 : vector<1x40xf32> to vector<8x40xf32>
    %7 = arith.addf %5, %6 : vector<8x40xf32>
    %cst_9 = arith.constant 0.000000e+00 : f32
    %8 = vector.broadcast %cst_9 : f32 to vector<8x40xf32>
    %9 = arith.maximumf %7, %8 : vector<8x40xf32>
    %cst_10 = arith.constant dense<0.000000e+00> : vector<8x4xf32>
    %10 = tpu.matmul %9, %2, %cst_10 {dimension_numbers = #tpu.dot_dimension_numbers<[1], [0], [0], [1], [0, 0, 1, 1], [], []>, precision = #tpu.contract_precision<fp32>} : vector<8x40xf32>, vector<40x4xf32>, vector<8x4xf32> -> vector<8x4xf32>
    %11 = vector.broadcast %3 : vector<1x4xf32> to vector<8x4xf32>
    %12 = arith.addf %10, %11 : vector<8x4xf32>
    %c0_11 = arith.constant 0 : index
    %c0_12 = arith.constant 0 : index
    %13 = vector.load %arg6[%c0_11, %c0_12] : memref<8x4xf32, #tpu.memory_space<vmem>>, vector<8x4xf32>
    tpu.vector_store %arg6[%c0_11, %c0_12], %12 {strides = array<i32>} : memref<8x4xf32, #tpu.memory_space<vmem>>, vector<8x4xf32>,
    return
  }
  func.func @transform_0(%arg0: i32) -> (i32, i32) {
    %c0_i32 = arith.constant 0 : i32
    %c0_i32_0 = arith.constant 0 : i32
    return %arg0, %c0_i32 : i32, i32
  }
  func.func @transform_1(%arg0: i32) -> (i32, i32) {
    %c0_i32 = arith.constant 0 : i32
    %c0_i32_0 = arith.constant 0 : i32
    %c0_i32_1 = arith.constant 0 : i32
    return %c0_i32, %c0_i32_0 : i32, i32
  }
  func.func @transform_2(%arg0: i32) -> (i32, i32) {
    %c0_i32 = arith.constant 0 : i32
    %c0_i32_0 = arith.constant 0 : i32
    %c0_i32_1 = arith.constant 0 : i32
    return %c0_i32, %c0_i32_0 : i32, i32
  }
  func.func @transform_3(%arg0: i32) -> (i32, i32) {
    %c0_i32 = arith.constant 0 : i32
    %c0_i32_0 = arith.constant 0 : i32
    %c0_i32_1 = arith.constant 0 : i32
    return %c0_i32, %c0_i32_0 : i32, i32
  }
  func.func @transform_4(%arg0: i32) -> (i32, i32) {
    %c0_i32 = arith.constant 0 : i32
    %c0_i32_0 = arith.constant 0 : i32
    %c0_i32_1 = arith.constant 0 : i32
    return %c0_i32, %c0_i32_0 : i32, i32
  }
  func.func @transform_5(%arg0: i32) -> (i32, i32) {
    %c0_i32 = arith.constant 0 : i32
    %c0_i32_0 = arith.constant 0 : i32
    return %arg0, %c0_i32 : i32, i32
  }
}

</mosaic_0001>

<bundles_post_ra>
// kernel: tpu_custom_call.1
= control target key start
LH: loop header
LB: loop body
LE: loop exit
PB: predicated region body
PF: predicated region fallthrough
CT: control target
= control target key end

     0   :  { %vm38_vm0 = vcmask 261120   ;;  %v1350_v0 = vmov 0.0|0.0   ;;  %vm1351_vm1 = vmmov 0   ;;  %v1352_v4 = vmov 0.0   ;;  %s1533_s1 = inlined_call_operand.vmem [shape: f32[32,40], index: 1, kind: input, shape index: {}]   ;;  %s1534_s0 = inlined_call_operand.vmem [shape: f32[8,32], index: 0, kind: input, shape index: {}]   ;;  %s1535_s3 = inlined_call_operand.vmem [shape: f32[40,4], index: 3, kind: input, shape index: {}]   ;;  %s1536_s2 = inlined_call_operand.vmem [shape: f32[1,40], index: 2, kind: input, shape index: {}]   ;;  %s1537_s4 = inlined_call_operand.vmem [shape: f32[1,4], index: 4, kind: input, shape index: {}]   ;;  %s1538_s5 = inlined_call_operand.vmem [shape: f32[8,4], index: 5, kind: output, shape index: {}]  }
   0x1   :  { %1254 = vmatprep.subr.bf16.mxu0 %v1350_v0  ;;  %v20_v1 = vld [vmem:[%s1533_s1] sm:$0xff]  ;;  %v21_v2 = vld [vmem:[%s1533_s1 + $0x8] sm:$0xff]  ;;  %v22_v3 = vld [vmem:[%s1533_s1 + $0x10] sm:$0xff]  ;;  %1118 = vmatprep.mubr.msk.f32.mxu0 %vm1351_vm1, %v1352_v4  ;;  %vm534_vm2 = vcmask 326656   ;;  %vm1036_vm3 = vcmask 31744  }
   0x2   :  { %v43_v5 = vand.u32 4294901760, %v20_v1  ;;  %v46_v6 = vand.u32 4294901760, %v21_v2  ;;  %v23_v7 = vld [vmem:[%s1533_s1 + $0x18] sm:$0xff]  ;;  %v49_v8 = vand.u32 4294901760, %v22_v3  ;;  %v31_v9 = vld [vmem:[%s1534_s0] sm:$0xff]  ;;  %1296 = vmatprep.subr.bf16.mxu1 %v1350_v0  ;;  %1199 = vmatprep.mubr.msk.f32.mxu1 %vm1351_vm1, %v1352_v4  ;;  %v1413_v13 = vld [vmem:[%s1535_s3 + $0x8] sm:$0xff] }
   0x3   :  { %v1405_v10 = vld [vmem:[%s1535_s3] sm:$0xff]  ;;  %v52_v11 = vand.u32 4294901760, %v23_v7  ;;  %v40_v12 = vsel %vm38_vm0, %v31_v9, 0  ;;  %v542_v25 = vand.u32 4294901760, %v1413_v13  ;;  %v27_v54 = vld [vmem:[%s1535_s3 + $0x10] sm:$0xff]  ;;  %v28_v55 = vld [vmem:[%s1535_s3 + $0x18] sm:$0xff] }
   0x4   :  { %v539_v14 = vand.u32 4294901760, %v1405_v10  ;;  %v1416_v15 = vpack.c.bf16 %v46_v6, %v43_v5  ;;  %v123_v16 = vsub.f32 %v20_v1, %v43_v5  ;;  %v130_v17 = vsub.f32 %v21_v2, %v46_v6  ;;  %v29_v62 = vld [vmem:[%s1535_s3 + $0x20] sm:$0xff] }
   0x5   :  { %v137_v18 = vsub.f32 %v22_v3, %v49_v8  ;;  %v1418_v19 = vpack.c.bf16 %v52_v11, %v49_v8  ;;  %v144_v20 = vsub.f32 %v23_v7, %v52_v11  ;;  %v1420_v21 = vand.u32 4294901760, %v40_v12 }
   0x6   :  { %1256 = vmatpush3.bf16.msra.mxu0 %v1416_v15  ;;  %v124_v22 = vand.u32 4294901760, %v123_v16  ;;  %v131_v23 = vand.u32 4294901760, %v130_v17  ;;  %v1429_v28 = vsub.f32 %v1405_v10, %v539_v14  ;;  %v1436_v37 = vsub.f32 %v1413_v13, %v542_v25  ;;  %v1042_v10 = vld [vmem:[%s1536_s2] ss:$0 sm:$0xff] }
   0x7   :  { %v138_v24 = vand.u32 4294901760, %v137_v18  ;;  %1257 = vmatprep.subr.bf16.mxu0 %v1350_v0  ;;  %v112_v26 = vsub.f32 %v40_v12, %v1420_v21  ;;  %v145_v27 = vand.u32 4294901760, %v144_v20  ;;  %v1267_v50 = vpack.c.bf16 %v130_v17, %v123_v16 }
   0x8   :  { %v125_v29 = vsub.f32 %v123_v16, %v124_v22  ;;  %v132_v30 = vsub.f32 %v130_v17, %v131_v23  ;;  %v621_v34 = vand.u32 4294901760, %v1429_v28  ;;  %v628_v43 = vand.u32 4294901760, %v1436_v37 }
   0x9   :  { %v139_v31 = vsub.f32 %v137_v18, %v138_v24  ;;  %v113_v32 = vand.u32 4294901760, %v112_v26  ;;  %v146_v33 = vsub.f32 %v144_v20, %v145_v27  ;;  %v1270_v51 = vpack.c.bf16 %v144_v20, %v137_v18 }
   0xa   :  { %1259 = vmatpush3.bf16.msra.mxu0 %v1418_v19  ;;  %v126_v35 = vand.u32 4294901760, %v125_v29  ;;  %v133_v36 = vand.u32 4294901760, %v132_v30  ;;  %v622_v39 = vsub.f32 %v1429_v28, %v621_v34  ;;  %v629_v46 = vsub.f32 %v1436_v37, %v628_v43  ;;  %v1043_v30 = vld [vmem:[%s1537_s4] ss:$0 sm:$0xff] }
   0xb   :  { %v114_v38 = vsub.f32 %v112_v26, %v113_v32  ;;  %1260 = vmatprep.subr.bf16.mxu0 %v1350_v0  ;;  %v140_v41 = vand.u32 4294901760, %v139_v31  ;;  %v147_v42 = vand.u32 4294901760, %v146_v33  ;;  %v1279_v52 = vpack.c.bf16 %v131_v23, %v124_v22 }
   0xc   :  { %v1261_v40 = vpack.c.bf16 %v133_v36, %v126_v35  ;;  %v623_v45 = vand.u32 4294901760, %v622_v39  ;;  %v630_v48 = vand.u32 4294901760, %v629_v46  ;;  %v1282_v53 = vpack.c.bf16 %v145_v27, %v138_v24 }
   0xd   :  { %v115_v44 = vand.u32 4294901760, %v114_v38  ;;  %v1264_v47 = vpack.c.bf16 %v147_v42, %v140_v41  ;;  %v545_v56 = vand.u32 4294901760, %v27_v54  ;;  %v548_v57 = vand.u32 4294901760, %v28_v55 }
   0xe   :  { %v1297_v49 = vpack.c.bf16 %v630_v48, %v623_v45  ;;  %v1485_v2 = vand.u32 4294901760, %v29_v62  ;;  %v1291_v12 = vpack.c.bf16 %v542_v25, %v539_v14  ;;  %v1315_v27 = vpack.c.bf16 %v628_v43, %v621_v34 }
   0xf   :  { %1119 = vmatmul.mubr.f32.vlgmr.msra.gmra.mrb[0].mxu0 %v115_v44  ;;  %v634_v58 = vsub.f32 %v27_v54, %v545_v56  ;;  %v641_v59 = vsub.f32 %v28_v55, %v548_v57 }
  0x10   :  { %1262 = vmatpush3.bf16.msra.mxu0 %v1261_v40  ;;  %1129 = vmatprep.mubr.msk.f32.mxu0 %vm1351_vm1, %v1352_v4  ;;  %v648_v6 = vsub.f32 %v29_v62, %v1485_v2 }
  0x11   :  { %1263 = vmatprep.subr.bf16.mxu0 %v1350_v0  ;;  %1298 = vmatpush3.bf16.msra.mxu1 %v1297_v49  ;;  %v635_v60 = vand.u32 4294901760, %v634_v58  ;;  %v642_v61 = vand.u32 4294901760, %v641_v59  ;;  %v1306_v16 = vpack.c.bf16 %v641_v59, %v634_v58 }
  0x12   :  { %1299 = vmatprep.subr.bf16.mxu1 %v1350_v0  ;;  %v649_v8 = vand.u32 4294901760, %v648_v6 }
  0x13   :  { %v636_v63 = vsub.f32 %v634_v58, %v635_v60  ;;  %v643_v1 = vsub.f32 %v641_v59, %v642_v61  ;;  %v1318_v17 = vpack.c.bf16 %v642_v61, %v635_v60 }
  0x14   :  { %1265 = vmatpush3.bf16.msra.mxu0 %v1264_v47  ;;  %v650_v9 = vsub.f32 %v648_v6, %v649_v8 }
  0x15   :  { %1266 = vmatprep.subr.bf16.mxu0 %v1350_v0  ;;  %v637_v3 = vand.u32 4294901760, %v636_v63  ;;  %v644_v5 = vand.u32 4294901760, %v643_v1 }
  0x16   :  { %v651_v11 = vand.u32 4294901760, %v650_v9 }
  0x17   :  { %1130 = vmatmul.mubr.f32.vlgmr.msra.gmra.mrb[0].mxu0 %v1420_v21  ;;  %v1300_v7 = vpack.c.bf16 %v644_v5, %v637_v3 }
  0x18   :  { %1268 = vmatpush3.bf16.msra.mxu0 %v1267_v50  ;;  %1140 = vmatprep.mubr.msk.f32.mxu0 %vm1351_vm1, %v1352_v4 }
  0x19   :  { %1269 = vmatprep.subr.bf16.mxu0 %v1350_v0  ;;  %1301 = vmatpush3.bf16.msra.mxu1 %v1300_v7 }
  0x1a   :  { %1197 = vmatprep.subr.mxu1 %v1352_v4 }
  0x1c   :  { %1271 = vmatpush3.bf16.msra.mxu0 %v1270_v51 }
  0x1d   :  { %1272 = vmatprep.subr.bf16.mxu0 %v1350_v0  ;;  %1198 = vmatpush3.msra.mxu1 %v651_v11 }
  0x1e   :  { %1302 = vmatprep.subr.bf16.mxu1 %v1350_v0 }
  0x1f   :  { %1141 = vmatmul.mubr.f32.vlgmr.msra.gmra.mrb[0].mxu0 %v112_v26 }
  0x20   :  { %1274 = vmatpush3.bf16.msra.mxu0 %v1416_v15  ;;  %1151 = vmatprep.mubr.msk.f32.mxu0 %vm1351_vm1, %v1352_v4 }
  0x21   :  { %1275 = vmatprep.subr.bf16.mxu0 %v1350_v0 }
  0x24   :  { %1277 = vmatpush3.bf16.msra.mxu0 %v1418_v19 }
  0x25   :  { %1278 = vmatprep.subr.bf16.mxu0 %v1350_v0 }
  0x27   :  { %1152 = vmatmul.mubr.f32.vlgmr.msra.gmra.mrb[0].mxu0 %v113_v32 }
  0x28   :  { %1280 = vmatpush3.bf16.msra.mxu0 %v1279_v52  ;;  %1162 = vmatprep.mubr.msk.f32.mxu0 %vm1351_vm1, %v1352_v4 }
  0x29   :  { %1281 = vmatprep.subr.bf16.mxu0 %v1350_v0 }
  0x2c   :  { %1283 = vmatpush3.bf16.msra.mxu0 %v1282_v53 }
  0x2d   :  { %1284 = vmatprep.subr.bf16.mxu0 %v1350_v0 }
  0x2f   :  { %1163 = vmatmul.mubr.f32.vlgmr.msra.gmra.mrb[0].mxu0 %v1420_v21 }
  0x30   :  { %1286 = vmatpush3.bf16.msra.mxu0 %v1416_v15  ;;  %1173 = vmatprep.mubr.msk.f32.mxu0 %vm1351_vm1, %v1352_v4  ;;  %v1294_v15 = vpack.c.bf16 %v548_v57, %v545_v56 }
  0x31   :  { %1287 = vmatprep.subr.bf16.mxu0 %v1350_v0 }
  0x34   :  { %1289 = vmatpush3.bf16.msra.mxu0 %v1418_v19 }
  0x35   :  { %1290 = vmatprep.subr.bf16.mxu0 %v1350_v0 }
  0x37   :  { %1174 = vmatmul.mubr.f32.vlgmr.msra.gmra.mrb[0].mxu0 %v1420_v21  ;;  %v1303_v21 = vpack.c.bf16 %v1436_v37, %v1429_v28 }
  0x38   :  { %1186 = vmatprep.mubr.msk.f32.mxu0 %vm1351_vm1, %v1352_v4  ;;  %1292 = vmatpush3.bf16.msra.mxu0 %v1291_v12 }
  0x39   :  { %1293 = vmatprep.subr.bf16.mxu0 %v1350_v0 }
  0x3c   :  { %1295 = vmatpush3.bf16.msra.mxu0 %v1294_v15 }
  0x3d   :  { %1184 = vmatprep.subr.mxu0 %v1352_v4 }
  0x40   :  { %1185 = vmatpush3.msra.mxu0 %v1485_v2 }
 0x10a   :  { %v523_v13 = vpop.f32.mrb[0].mxu0 }
 0x10b   :  { %v1326_v14 = vadd.f32 %v1042_v10, %v523_v13  ;;  %v1175_v18 = vpop.f32.mrb[1].mxu0 }
 0x10d   :  { %v527_v19 = vmax.f32 %v1326_v14, 0.0 }
 0x10f   :  { %v536_v20 = vsel %vm534_vm2, %v527_v19, 0 }
 0x110   :  { %v608_v22 = vand.u32 4294901760, %v536_v20 }
 0x112   :  { %v609_v23 = vsub.f32 %v536_v20, %v608_v22  ;;  %1200 = vmatmul.mubr.f32.vlgmr.msra.gmra.mrb[0].mxu1 %v608_v22 }
 0x113   :  { %1304 = vmatpush3.bf16.msra.mxu1 %v1303_v21  ;;  %1212 = vmatprep.mubr.msk.f32.mxu1 %vm1351_vm1, %v1352_v4 }
 0x114   :  { %v610_v24 = vand.u32 4294901760, %v609_v23  ;;  %1305 = vmatprep.subr.bf16.mxu1 %v1350_v0 }
 0x116   :  { %v611_v25 = vsub.f32 %v609_v23, %v610_v24 }
 0x117   :  { %1307 = vmatpush3.bf16.msra.mxu1 %v1306_v16 }
 0x118   :  { %1210 = vmatprep.subr.mxu1 %v1352_v4  ;;  %v612_v26 = vand.u32 4294901760, %v611_v25 }
 0x11a   :  { %1187 = vmatmul.mubr.f32.vlgmr.msra.gmra.mrb[2].mxu0 %v612_v26 }
 0x11b   :  { %1211 = vmatpush3.msra.mxu1 %v648_v6 }
 0x11c   :  { %1213 = vmatmul.mubr.f32.vlgmr.msra.gmra.mrb[0].mxu1 %v609_v23  ;;  %1308 = vmatprep.subr.bf16.mxu1 %v1350_v0 }
 0x11d   :  { %1310 = vmatpush3.bf16.msra.mxu1 %v1291_v12  ;;  %1225 = vmatprep.mubr.msk.f32.mxu1 %vm1351_vm1, %v1352_v4 }
 0x11e   :  { %1311 = vmatprep.subr.bf16.mxu1 %v1350_v0 }
 0x121   :  { %1313 = vmatpush3.bf16.msra.mxu1 %v1294_v15 }
 0x122   :  { %1223 = vmatprep.subr.mxu1 %v1352_v4 }
 0x125   :  { %1224 = vmatpush3.msra.mxu1 %v1485_v2 }
 0x126   :  { %1226 = vmatmul.mubr.f32.vlgmr.msra.gmra.mrb[0].mxu1 %v610_v24  ;;  %1314 = vmatprep.subr.bf16.mxu1 %v1350_v0 }
 0x127   :  { %1316 = vmatpush3.bf16.msra.mxu1 %v1315_v27  ;;  %1238 = vmatprep.mubr.msk.f32.mxu1 %vm1351_vm1, %v1352_v4 }
 0x128   :  { %1317 = vmatprep.subr.bf16.mxu1 %v1350_v0 }
 0x12b   :  { %1319 = vmatpush3.bf16.msra.mxu1 %v1318_v17 }
 0x12c   :  { %1236 = vmatprep.subr.mxu1 %v1352_v4 }
 0x12f   :  { %1237 = vmatpush3.msra.mxu1 %v649_v8 }
 0x130   :  { %1239 = vmatmul.mubr.f32.vlgmr.msra.gmra.mrb[0].mxu1 %v608_v22  ;;  %1320 = vmatprep.subr.bf16.mxu1 %v1350_v0 }
 0x131   :  { %1322 = vmatpush3.bf16.msra.mxu1 %v1291_v12  ;;  %1251 = vmatprep.mubr.msk.f32.mxu1 %vm1351_vm1, %v1352_v4 }
 0x132   :  { %1323 = vmatprep.subr.bf16.mxu1 %v1350_v0 }
 0x135   :  { %1325 = vmatpush3.bf16.msra.mxu1 %v1294_v15 }
 0x136   :  { %1249 = vmatprep.subr.mxu1 %v1352_v4 }
 0x139   :  { %1250 = vmatpush3.msra.mxu1 %v1485_v2 }
 0x13a   :  { %1252 = vmatmul.mubr.f32.vlgmr.msra.gmra.mrb[0].mxu1 %v608_v22 }
 0x1ed   :  { %v614_v28 = vpop.f32.mrb[2].mxu0 }
 0x1ee   :  { %v1188_v29 = vpop.f32.mrb[3].mxu0  ;;  %v615_v31 = vadd.f32 %v1043_v30, %v614_v28 }
 0x20d   :  { %v1032_v32 = vpop.f32.mrb[0].mxu1 }
 0x20e   :  { %v1328_v33 = vadd.f32 %v1032_v32, %v615_v31  ;;  %v1253_v34 = vpop.f32.mrb[1].mxu1 }
 0x210   :  { %1037 = vst.msk [vmem:[%s1538_s5] sm:$0xff] %vm1036_vm3, %v1328_v33 }

</bundles_post_ra>
